<compile_context>
chip_gen: v6e
topology: v6e:2x2x1
jax: 0.10.0
libtpu: 0.0.40
codegen_flags: <defaults>
</compile_context>

<pallas_src>
import functools
import math

import jax
import jax.numpy as jnp
import numpy as np
from jax.experimental import pallas as pl
from jax.experimental.pallas import tpu as pltpu


def _cdiv(a, b):
    return -(-a // b)


def _round_up(a, b):
    return _cdiv(a, b) * b


def _ceil_pool_out(size, k, s):
    """PyTorch MaxPool2d output size with ceil_mode=True, padding=0."""
    out = math.ceil((size - k) / s) + 1
    # PyTorch rule: the last window must start inside the input (padding=0).
    if (out - 1) * s >= size:
        out -= 1
    return max(out, 1)


def _max_identity(dtype):
    """Identity element of `max` for the given dtype."""
    dtype = jnp.dtype(dtype)
    if dtype == jnp.dtype(jnp.bool_):
        return False
    if jnp.issubdtype(dtype, jnp.floating):
        return -float("inf")
    if jnp.issubdtype(dtype, jnp.integer):
        return int(jnp.iinfo(dtype).min)
    raise ValueError(f"unsupported dtype for maxpool: {dtype}")


def _vmem_capacity_bytes():
    """Physical VMEM of the current TPU generation (conservative fallback)."""
    try:
        info = pltpu.get_tpu_info()
        cap = getattr(info, "vmem_capacity_bytes", None)
        if cap:
            return int(cap)
    except Exception:
        pass
    return 64 * 1024 * 1024  # v7x-sized fallback: safe on every generation.


def _balanced_tile(total, target):
    """Split `total` into g equal-ish tiles of size <= target. Returns (tile, g)."""
    target = max(1, min(int(target), total))
    g = _cdiv(total, target)
    tile = _cdiv(total, g)
    return tile, g


def _balanced_tile_mult(total, target, mult):
    """Like _balanced_tile, but tiles must be a multiple of `mult` unless they
    cover the whole axis."""
    if target >= total:
        return total, 1
    tile = max(mult, (int(target) // mult) * mult)
    g = _cdiv(total, tile)
    tile = _round_up(_cdiv(total, g), mult)
    g = _cdiv(total, tile)
    return tile, g


def _pool_kernel(x_ref, o_ref):
    # x_ref: (k, k, th, tw, c_blk)   o_ref: (th, tw, c_blk)
    # Pure element-wise VPU maxima over the k*k taps (leading dims -> just
    # picking different vregs, no cross-lane or sublane shuffles); the output
    # store is lane dense (c_blk is a multiple of 128).
    kh, kw = x_ref.shape[0], x_ref.shape[1]
    acc = x_ref[0, 0]
    for di in range(kh):
        for dj in range(kw):
            if di == 0 and dj == 0:
                continue
            acc = jnp.maximum(acc, x_ref[di, dj])
    o_ref[...] = acc


@functools.partial(jax.jit, static_argnames=("kernel_size", "stride"))
def maxpool2d_ceil(x, kernel_size=3, stride=None):
    """Equivalent of nn.MaxPool2d(kernel_size=3, ceil_mode=True) on NCHW input."""
    if stride is None:
        stride = kernel_size
    k, s = int(kernel_size), int(stride)
    if s != k:
        # TODO(synk): overlapping windows (stride != kernel_size) would need
        # overlapping / Element-indexed BlockSpecs; the spec module uses the
        # default stride == kernel_size.
        raise NotImplementedError("only stride == kernel_size is supported")

    N, C, H, W = x.shape
    H_out = _ceil_pool_out(H, k, s)
    W_out = _ceil_pool_out(W, k, s)
    KK = k * k
    NC = N * C
    itemsize = jnp.dtype(x.dtype).itemsize
    neg = _max_identity(x.dtype)

    sub_mult = 8 * max(1, 4 // itemsize)   # sublane multiple: 8 f32, 16 bf16, 32 int8
    m = _cdiv(NC, 128)                     # channel extent in 128-lane units

    # ---- generation-aware block sizing -------------------------------------
    vmem_cap = _vmem_capacity_bytes()
    target_in = min(16 * 1024 * 1024, vmem_cap // 8)   # 16 MiB v5e/v6e, 8 MiB v7x

    row_full = KK * W_out * 128 * m * itemsize   # th=1, full W, full channels
    col128 = KK * W_out * 128 * itemsize         # th=1, full W, 128 channels
    if row_full <= target_in:
        # Tile only H_out; keep channels and W whole (long contiguous DMA rows).
        th_t, tw_t, mc_t = target_in // row_full, W_out, m
    elif col128 <= target_in:
        # One output row per block; tile channels.
        th_t, tw_t = 1, W_out
        mc_t = max(1, target_in // col128)
    else:
        # Degenerate very-wide case: tile W too, keep >=512 B contiguous lanes.
        th_t = 1
        mc_t = min(m, max(1, _cdiv(512, 128 * itemsize)))
        tw_t = max(sub_mult, target_in // (KK * 128 * mc_t * itemsize))

    th, g_h = _balanced_tile(H_out, th_t)
    mc, g_c = _balanced_tile(m, mc_t)
    tw, g_w = _balanced_tile_mult(W_out, tw_t, sub_mult)

    # Guarantee >= 2 grid blocks so v7x's two TensorCores both get work
    # (one extra ~0.35 us grid step is noise on single-TC chips).
    if g_h * g_w * g_c == 1:
        if H_out >= 2:
            th, g_h = _balanced_tile(H_out, _cdiv(H_out, 2))
        elif m >= 2:
            mc, g_c = _balanced_tile(m, _cdiv(m, 2))
        elif W_out >= 2 * sub_mult:
            tw, g_w = _balanced_tile_mult(W_out, _cdiv(W_out, 2), sub_mult)

    c_blk = 128 * mc
    nc_pad = c_blk * g_c
    H_pad_out = th * g_h
    W_pad_out = tw * g_w
    Hp = H_pad_out * k
    Wp = W_pad_out * k

    # ---- layout plumbing: ONE pad + reshape + transpose pass in XLA --------
    # Pad the ceil_mode overhang and the block padding with the max-identity,
    # then lay out as (k, k, H_out_pad, W_out_pad, N*C).
    xp = jnp.pad(x, ((0, 0), (0, 0), (0, Hp - H), (0, Wp - W)),
                 constant_values=neg)
    xt = xp.reshape(N, C, H_pad_out, k, W_pad_out, k)
    xt = jnp.transpose(xt, (3, 5, 2, 4, 0, 1)).reshape(k, k, H_pad_out, W_pad_out, NC)
    if nc_pad > NC:
        xt = jnp.pad(xt, ((0, 0), (0, 0), (0, 0), (0, 0), (0, nc_pad - NC)),
                     constant_values=neg)

    in_blk_bytes = KK * th * tw * c_blk * itemsize
    out_blk_bytes = th * tw * c_blk * itemsize
    vmem_limit = max(32 * 1024 * 1024,
                     2 * in_blk_bytes + 4 * out_blk_bytes + 16 * 1024 * 1024)
    vmem_limit = min(vmem_limit, int(vmem_cap * 0.9))

    cost = pl.CostEstimate(
        flops=(KK - 1) * H_pad_out * W_pad_out * nc_pad,
        transcendentals=0,
        bytes_accessed=(KK + 1) * H_pad_out * W_pad_out * nc_pad * itemsize,
    )

    out = pl.pallas_call(
        _pool_kernel,
        out_shape=jax.ShapeDtypeStruct((H_pad_out, W_pad_out, nc_pad), x.dtype),
        grid=(g_h, g_w, g_c),
        in_specs=[pl.BlockSpec((k, k, th, tw, c_blk),
                               lambda i, j, c: (0, 0, i, j, c))],
        out_specs=pl.BlockSpec((th, tw, c_blk), lambda i, j, c: (i, j, c)),
        compiler_params=pltpu.CompilerParams(
            dimension_semantics=("parallel", "parallel", "parallel"),
            vmem_limit_bytes=vmem_limit,
        ),
        cost_estimate=cost,
    )(xt)

    # Drop padding and return to NCHW.
    out = out[:H_out, :W_out, :NC].reshape(H_out, W_out, N, C)
    return jnp.transpose(out, (2, 3, 0, 1))


def _np_maxpool_ceil(xn, k):
    """Numpy reference for MaxPool2d(kernel_size=k, stride=k, ceil_mode=True)."""
    N, C, H, W = xn.shape
    Ho = _ceil_pool_out(H, k, k)
    Wo = _ceil_pool_out(W, k, k)
    ref = np.empty((N, C, Ho, Wo), dtype=xn.dtype)
    for i in range(Ho):
        for j in range(Wo):
            ref[:, :, i, j] = xn[:, :, k * i:k * i + k, k * j:k * j + k].max(axis=(2, 3))
    return ref


if __name__ == "__main__":
    key = jax.random.PRNGKey(0)

    # Primary case: matches the module's typical use.
    x = jax.random.normal(key, (2, 4, 16, 16), dtype=jnp.float32)
    y = jax.block_until_ready(maxpool2d_ceil(x, kernel_size=3))
    np.testing.assert_allclose(np.asarray(y), _np_maxpool_ceil(np.asarray(x), 3),
                               rtol=0, atol=0)

    # Secondary case: non-divisible spatial dims exercising the ceil_mode
    # overhang and block/lane padding paths.
    x2 = jax.random.normal(jax.random.PRNGKey(0), (2, 3, 10, 7), dtype=jnp.float32)
    y2 = jax.block_until_ready(maxpool2d_ceil(x2, kernel_size=3))
    np.testing.assert_allclose(np.asarray(y2), _np_maxpool_ceil(np.asarray(x2), 3),
                               rtol=0, atol=0)

    print("KERNEL_OK")
</pallas_src>

<mosaic_0001>
module attributes {stable_mosaic.version = 11 : i64} {
  func.func @_pool_kernel(%arg0: i32, %arg1: i32, %arg2: i32, %arg3: memref<3x3x3x6x128xf32, #tpu.memory_space<vmem>>, %arg4: memref<3x6x128xf32, #tpu.memory_space<vmem>>) attributes {dimension_semantics = [#tpu.dimension_semantics<parallel>, #tpu.dimension_semantics<parallel>, #tpu.dimension_semantics<parallel>], iteration_bounds = array<i64: 2, 1, 1>, scalar_prefetch = 0 : i64, scratch_operands = 0 : i64, tpu.core_type = #tpu.core_type<tc>, window_params = [{transform_indices = @transform_0, window_bounds = array<i64: 3, 3, 3, 6, 128>}, {transform_indices = @transform_1, window_bounds = array<i64: 3, 6, 128>}]} {
    %c0 = arith.constant 0 : index
    %c0_0 = arith.constant 0 : index
    %c0_1 = arith.constant 0 : index
    %c0_2 = arith.constant 0 : index
    %c0_3 = arith.constant 0 : index
    %0 = vector.load %arg3[%c0, %c0_0, %c0_1, %c0_2, %c0_3] : memref<3x3x3x6x128xf32, #tpu.memory_space<vmem>>, vector<1x1x3x6x128xf32>
    %1 = vector.shape_cast %0 : vector<1x1x3x6x128xf32> to vector<3x6x128xf32>
    %c0_4 = arith.constant 0 : index
    %c1 = arith.constant 1 : index
    %c0_5 = arith.constant 0 : index
    %c0_6 = arith.constant 0 : index
    %c0_7 = arith.constant 0 : index
    %2 = vector.load %arg3[%c0_4, %c1, %c0_5, %c0_6, %c0_7] : memref<3x3x3x6x128xf32, #tpu.memory_space<vmem>>, vector<1x1x3x6x128xf32>
    %3 = vector.shape_cast %2 : vector<1x1x3x6x128xf32> to vector<3x6x128xf32>
    %4 = arith.maximumf %1, %3 : vector<3x6x128xf32>
    %c0_8 = arith.constant 0 : index
    %c2 = arith.constant 2 : index
    %c0_9 = arith.constant 0 : index
    %c0_10 = arith.constant 0 : index
    %c0_11 = arith.constant 0 : index
    %5 = vector.load %arg3[%c0_8, %c2, %c0_9, %c0_10, %c0_11] : memref<3x3x3x6x128xf32, #tpu.memory_space<vmem>>, vector<1x1x3x6x128xf32>
    %6 = vector.shape_cast %5 : vector<1x1x3x6x128xf32> to vector<3x6x128xf32>
    %7 = arith.maximumf %4, %6 : vector<3x6x128xf32>
    %c1_12 = arith.constant 1 : index
    %c0_13 = arith.constant 0 : index
    %c0_14 = arith.constant 0 : index
    %c0_15 = arith.constant 0 : index
    %c0_16 = arith.constant 0 : index
    %8 = vector.load %arg3[%c1_12, %c0_13, %c0_14, %c0_15, %c0_16] : memref<3x3x3x6x128xf32, #tpu.memory_space<vmem>>, vector<1x1x3x6x128xf32>
    %9 = vector.shape_cast %8 : vector<1x1x3x6x128xf32> to vector<3x6x128xf32>
    %10 = arith.maximumf %7, %9 : vector<3x6x128xf32>
    %c1_17 = arith.constant 1 : index
    %c1_18 = arith.constant 1 : index
    %c0_19 = arith.constant 0 : index
    %c0_20 = arith.constant 0 : index
    %c0_21 = arith.constant 0 : index
    %11 = vector.load %arg3[%c1_17, %c1_18, %c0_19, %c0_20, %c0_21] : memref<3x3x3x6x128xf32, #tpu.memory_space<vmem>>, vector<1x1x3x6x128xf32>
    %12 = vector.shape_cast %11 : vector<1x1x3x6x128xf32> to vector<3x6x128xf32>
    %13 = arith.maximumf %10, %12 : vector<3x6x128xf32>
    %c1_22 = arith.constant 1 : index
    %c2_23 = arith.constant 2 : index
    %c0_24 = arith.constant 0 : index
    %c0_25 = arith.constant 0 : index
    %c0_26 = arith.constant 0 : index
    %14 = vector.load %arg3[%c1_22, %c2_23, %c0_24, %c0_25, %c0_26] : memref<3x3x3x6x128xf32, #tpu.memory_space<vmem>>, vector<1x1x3x6x128xf32>
    %15 = vector.shape_cast %14 : vector<1x1x3x6x128xf32> to vector<3x6x128xf32>
    %16 = arith.maximumf %13, %15 : vector<3x6x128xf32>
    %c2_27 = arith.constant 2 : index
    %c0_28 = arith.constant 0 : index
    %c0_29 = arith.constant 0 : index
    %c0_30 = arith.constant 0 : index
    %c0_31 = arith.constant 0 : index
    %17 = vector.load %arg3[%c2_27, %c0_28, %c0_29, %c0_30, %c0_31] : memref<3x3x3x6x128xf32, #tpu.memory_space<vmem>>, vector<1x1x3x6x128xf32>
    %18 = vector.shape_cast %17 : vector<1x1x3x6x128xf32> to vector<3x6x128xf32>
    %19 = arith.maximumf %16, %18 : vector<3x6x128xf32>
    %c2_32 = arith.constant 2 : index
    %c1_33 = arith.constant 1 : index
    %c0_34 = arith.constant 0 : index
    %c0_35 = arith.constant 0 : index
    %c0_36 = arith.constant 0 : index
    %20 = vector.load %arg3[%c2_32, %c1_33, %c0_34, %c0_35, %c0_36] : memref<3x3x3x6x128xf32, #tpu.memory_space<vmem>>, vector<1x1x3x6x128xf32>
    %21 = vector.shape_cast %20 : vector<1x1x3x6x128xf32> to vector<3x6x128xf32>
    %22 = arith.maximumf %19, %21 : vector<3x6x128xf32>
    %c2_37 = arith.constant 2 : index
    %c2_38 = arith.constant 2 : index
    %c0_39 = arith.constant 0 : index
    %c0_40 = arith.constant 0 : index
    %c0_41 = arith.constant 0 : index
    %23 = vector.load %arg3[%c2_37, %c2_38, %c0_39, %c0_40, %c0_41] : memref<3x3x3x6x128xf32, #tpu.memory_space<vmem>>, vector<1x1x3x6x128xf32>
    %24 = vector.shape_cast %23 : vector<1x1x3x6x128xf32> to vector<3x6x128xf32>
    %25 = arith.maximumf %22, %24 : vector<3x6x128xf32>
    %c0_42 = arith.constant 0 : index
    %c0_43 = arith.constant 0 : index
    %c0_44 = arith.constant 0 : index
    %26 = vector.load %arg4[%c0_42, %c0_43, %c0_44] : memref<3x6x128xf32, #tpu.memory_space<vmem>>, vector<3x6x128xf32>
    tpu.vector_store %arg4[%c0_42, %c0_43, %c0_44], %25 {strides = array<i32>} : memref<3x6x128xf32, #tpu.memory_space<vmem>>, vector<3x6x128xf32>,
    return
  }
  func.func @transform_0(%arg0: i32, %arg1: i32, %arg2: i32) -> (i32, i32, i32, i32, i32) {
    %c0_i32 = arith.constant 0 : i32
    %c0_i32_0 = arith.constant 0 : i32
    %c0_i32_1 = arith.constant 0 : i32
    return %c0_i32, %c0_i32_0, %arg0, %arg1, %arg2 : i32, i32, i32, i32, i32
  }
  func.func @transform_1(%arg0: i32, %arg1: i32, %arg2: i32) -> (i32, i32, i32) {
    %c0_i32 = arith.constant 0 : i32
    return %arg0, %arg1, %arg2 : i32, i32, i32
  }
}

</mosaic_0001>

<bundles_post_ra>
// kernel: maxpool2d_ceil.1
= control target key start
LH: loop header
LB: loop body
LE: loop exit
PB: predicated region body
PF: predicated region fallthrough
CT: control target
= control target key end

     0   :  { %s585_s6 = smov 0   ;;  %s587_s7 = smov 0   ;;  %s737_s0 = inlined_call_operand.vmem [shape: f32[3,3,6,6,128], index: 0, kind: input, shape index: {}]   ;;  %s738_s1 = inlined_call_operand.vmem [shape: f32[6,6,128], index: 1, kind: output, shape index: {}]  }
   0x1   :  { %s589_s8 = smov 0   ;;  %s591_s9 = smov 0  }
   0x2   :  { %s593_s10 = smov 0  }
   0x3 LB: > { %s30_s11 = sadd.s32 1, %s569_s9  ;;  %p48_p1 = scmp.ne.s32.totalorder %s561_s7, %s557_s6  ;;  %s573_s10 = sphi %s593_s10, %s11_s10   ;;  %s569_s9 = sphi %s591_s9, %s742_s9   ;;  %s565_s8 = sphi %s589_s8, %s741_s8   ;;  %s561_s7 = sphi %s587_s7, %s740_s7   ;;  %s557_s6 = sphi %s585_s6, %s739_s6  }
   0x4   : > { %p32_p0 = scmp.ge.s32.totalorder %s30_s11, 2  ;;  %p49_p2 = scmp.eq.s32.totalorder %s573_s10, 0 }
   0x5   : > { %s41_s13 = sadd.s32 1, %s561_s7  ;;  %p462_p5 = scmp.ge.s32.totalorder %s573_s10, 2 }
   0x6   : > { %s744_s11 = smov (%p32_p0, %s30_s11), 0  ;;  %p50_p3 = por %p49_p2, %p48_p1 }
   0x7   : > { %s34_s12 = ssub.s32 %s569_s9, %s744_s11  ;;  %104 = sbr.rel (%p462_p5) target bundleno = 31 (0x1f), region = 16 }
   0x8   : > { %p39_p4 = scmp.eq.s32.totalorder %s34_s12, 0 }
   0xa   : > { %s620_s14 = scalar_select %p39_p4, %s561_s7, %s41_s13  }
   0xc   : > { %107 = sbr.rel (!%p50_p3) target bundleno = 31 (0x1f), region = 20  ;;  %s109_s15 = sand.u32 (%p50_p3), 1, %s561_s7  }
   0xd   : > { %s492_s16 = smul.u32 (%p50_p3), 24, %s569_s9 }
   0xe   : > { %s493_s17 = smul.u32 (%p50_p3), 216, %s109_s15 }
   0xf   : > { %s628_s20 = scalar_lea.vmem (%p50_p3), %s737_s0, %s492_s16 }
  0x10   : > { %v197_v0 = vld [vmem:[%s628_s20] sm:$0xff] (%p50_p3)  ;;  %v199_v1 = vld [vmem:[%s628_s20 + $0x8] sm:$0xff] (%p50_p3)  ;;  %v201_v2 = vld [vmem:[%s628_s20 + $0x10] sm:$0xff] (%p50_p3)  ;;  %s633_s21 = scalar_lea.vmem (%p50_p3), [#allocation2], %s493_s17 }
  0x11   : > { %198 = vst [vmem:[%s633_s21] sm:$0xff] %v197_v0  ;;  %200 = vst [vmem:[%s633_s21 + $0x8] sm:$0xff] %v199_v1  ;;  %v203_v3 = vld [vmem:[%s628_s20 + $0x30] sm:$0xff]  ;;  %v205_v4 = vld [vmem:[%s628_s20 + $0x38] sm:$0xff] }
  0x12   : > { %202 = vst [vmem:[%s633_s21 + $0x10] sm:$0xff] %v201_v2  ;;  %v207_v5 = vld [vmem:[%s628_s20 + $0x40] sm:$0xff]  ;;  %204 = vst [vmem:[%s633_s21 + $0x18] sm:$0xff] %v203_v3  ;;  %v211_v7 = vld [vmem:[%s628_s20 + $0x68] sm:$0xff] }
  0x13   : > { %206 = vst [vmem:[%s633_s21 + $0x20] sm:$0xff] %v205_v4  ;;  %208 = vst [vmem:[%s633_s21 + $0x28] sm:$0xff] %v207_v5  ;;  %v209_v6 = vld [vmem:[%s628_s20 + $0x60] sm:$0xff]  ;;  %v213_v8 = vld [vmem:[%s628_s20 + $0x70] sm:$0xff] }
  0x14   : > { %210 = vst [vmem:[%s633_s21 + $0x30] sm:$0xff] %v209_v6  ;;  %212 = vst [vmem:[%s633_s21 + $0x38] sm:$0xff] %v211_v7  ;;  %v215_v9 = vld [vmem:[%s628_s20 + $0x90] sm:$0xff]  ;;  %v217_v10 = vld [vmem:[%s628_s20 + $0x98] sm:$0xff] }
  0x15   : > { %214 = vst [vmem:[%s633_s21 + $0x40] sm:$0xff] %v213_v8  ;;  %v219_v11 = vld [vmem:[%s628_s20 + $0xa0] sm:$0xff]  ;;  %216 = vst [vmem:[%s633_s21 + $0x48] sm:$0xff] %v215_v9  ;;  %v223_v13 = vld [vmem:[%s628_s20 + $0xc8] sm:$0xff] }
  0x16   : > { %218 = vst [vmem:[%s633_s21 + $0x50] sm:$0xff] %v217_v10  ;;  %220 = vst [vmem:[%s633_s21 + $0x58] sm:$0xff] %v219_v11  ;;  %v221_v12 = vld [vmem:[%s628_s20 + $0xc0] sm:$0xff]  ;;  %v225_v14 = vld [vmem:[%s628_s20 + $0xd0] sm:$0xff] }
  0x17   : > { %222 = vst [vmem:[%s633_s21 + $0x60] sm:$0xff] %v221_v12  ;;  %224 = vst [vmem:[%s633_s21 + $0x68] sm:$0xff] %v223_v13  ;;  %v227_v15 = vld [vmem:[%s628_s20 + $0xf0] sm:$0xff]  ;;  %v229_v16 = vld [vmem:[%s628_s20 + $0xf8] sm:$0xff] }
  0x18   : > { %226 = vst [vmem:[%s633_s21 + $0x70] sm:$0xff] %v225_v14  ;;  %v231_v17 = vld [vmem:[%s628_s20 + $0x100] sm:$0xff]  ;;  %228 = vst [vmem:[%s633_s21 + $0x78] sm:$0xff] %v227_v15  ;;  %v235_v19 = vld [vmem:[%s628_s20 + $0x128] sm:$0xff] }
  0x19   : > { %230 = vst [vmem:[%s633_s21 + $0x80] sm:$0xff] %v229_v16  ;;  %232 = vst [vmem:[%s633_s21 + $0x88] sm:$0xff] %v231_v17  ;;  %v233_v18 = vld [vmem:[%s628_s20 + $0x120] sm:$0xff]  ;;  %v237_v20 = vld [vmem:[%s628_s20 + $0x130] sm:$0xff] }
  0x1a   : > { %234 = vst [vmem:[%s633_s21 + $0x90] sm:$0xff] %v233_v18  ;;  %236 = vst [vmem:[%s633_s21 + $0x98] sm:$0xff] %v235_v19  ;;  %v239_v21 = vld [vmem:[%s628_s20 + $0x150] sm:$0xff]  ;;  %v241_v22 = vld [vmem:[%s628_s20 + $0x158] sm:$0xff] }
  0x1b   : > { %238 = vst [vmem:[%s633_s21 + $0xa0] sm:$0xff] %v237_v20  ;;  %v243_v23 = vld [vmem:[%s628_s20 + $0x160] sm:$0xff]  ;;  %240 = vst [vmem:[%s633_s21 + $0xa8] sm:$0xff] %v239_v21  ;;  %v247_v25 = vld [vmem:[%s628_s20 + $0x188] sm:$0xff] }
  0x1c   : > { %242 = vst [vmem:[%s633_s21 + $0xb0] sm:$0xff] %v241_v22  ;;  %244 = vst [vmem:[%s633_s21 + $0xb8] sm:$0xff] %v243_v23  ;;  %v245_v24 = vld [vmem:[%s628_s20 + $0x180] sm:$0xff]  ;;  %v249_v26 = vld [vmem:[%s628_s20 + $0x190] sm:$0xff] }
  0x1d   : > { %246 = vst [vmem:[%s633_s21 + $0xc0] sm:$0xff] %v245_v24  ;;  %248 = vst [vmem:[%s633_s21 + $0xc8] sm:$0xff] %v247_v25 }
  0x1e   : > { %250 = vst [vmem:[%s633_s21 + $0xd0] sm:$0xff] %v249_v26 }
  0x1f PF: > { %p464_p6 = scmp.ge.s32.totalorder %s573_s10, 1  ;;  %p255_p7 = scmp.lt.s32.totalorder %s573_s10, 3 }
  0x21   : > { %p256_p8 = pnand %p464_p6, %p255_p7 }
  0x22   : > { %s262_s22 = sand.u32 (!%p256_p8), 1, %s557_s6   ;;  %s288_s24 = smul.u32 (!%p256_p8), 3, %s565_s8 }
  0x23   : > { %259 = sbr.rel (%p256_p8) target bundleno = 62 (0x3e), region = 58 }
  0x24   : > { %s494_s23 = smul.u32 (!%p256_p8), 216, %s262_s22  ;;  %p289_p9 = scmp.lt.s32.totalorder (!%p256_p8), %s288_s24, 5 }
  0x26   : > { %s690_s25 = scalar_lea.vmem (!%p256_p8), [#allocation2], %s494_s23 }
  0x28   : > { %v300_v27 = vld [vmem:[%s690_s25] sm:$0x3f]  ;;  %v466_v28 = vld [vmem:[%s690_s25 + $0x18] sm:$0x3f]  ;;  %v469_v30 = vld [vmem:[%s690_s25 + $0x30] sm:$0x3f] }
  0x29   : > { %v307_v29 = vmax.f32 %v300_v27, %v466_v28  ;;  %v472_v31 = vld [vmem:[%s690_s25 + $0x48] sm:$0x3f]  ;;  %v475_v34 = vld [vmem:[%s690_s25 + $0x60] sm:$0x3f]  ;;  %v470_v36 = vld [vmem:[%s690_s25 + $0x38] sm:$0x3f] }
  0x2a   : > { %v301_v33 = vld [vmem:[%s690_s25 + $0x8] sm:$0x3f]  ;;  %v467_v35 = vld [vmem:[%s690_s25 + $0x20] sm:$0x3f]  ;;  %v478_v39 = vld [vmem:[%s690_s25 + $0x78] sm:$0x3f] }
  0x2b   : > { %v314_v32 = vmax.f32 %v307_v29, %v469_v30  ;;  %v308_v38 = vmax.f32 %v301_v33, %v467_v35  ;;  %v473_v40 = vld [vmem:[%s690_s25 + $0x50] sm:$0x3f]  ;;  %s746_s24 = smov (!%p289_p9, %s288_s24), 5  ;;  %v468_v44 = vld [vmem:[%s690_s25 + $0x28] sm:$0x3f] }
  0x2c   : > { %v302_v41 = vld [vmem:[%s690_s25 + $0x10] sm:$0x3f]  ;;  %v471_v45 = vld [vmem:[%s690_s25 + $0x40] sm:$0x3f]  ;;  %v476_v47 = vld [vmem:[%s690_s25 + $0x68] sm:$0x3f] }
  0x2d   : > { %v321_v37 = vmax.f32 %v314_v32, %v472_v31  ;;  %v315_v43 = vmax.f32 %v308_v38, %v470_v36  ;;  %v481_v46 = vld [vmem:[%s690_s25 + $0x90] sm:$0x3f]  ;;  %v309_v48 = vmax.f32 %v302_v41, %v468_v44  ;;  %v474_v51 = vld [vmem:[%s690_s25 + $0x58] sm:$0x3f]  ;;  %v484_v52 = vld [vmem:[%s690_s25 + $0xa8] sm:$0x3f] }
  0x2e   : > { %v479_v53 = vld [vmem:[%s690_s25 + $0x80] sm:$0x3f]  ;;  %s465_s26 = sshll.u32 %s746_s24, 3  ;;  %v477_v57 = vld [vmem:[%s690_s25 + $0x70] sm:$0x3f] }
  0x2f   : > { %v328_v42 = vmax.f32 %v321_v37, %v475_v34  ;;  %v322_v50 = vmax.f32 %v315_v43, %v473_v40  ;;  %v316_v54 = vmax.f32 %v309_v48, %v471_v45  ;;  %v487_v58 = vld [vmem:[%s690_s25 + $0xc0] sm:$0x3f]  ;;  %v482_v59 = vld [vmem:[%s690_s25 + $0x98] sm:$0x3f]  ;;  %v480_v63 = vld [vmem:[%s690_s25 + $0x88] sm:$0x3f]  ;;  %s298_s29 = scalar_lea.vmem %s738_s1, %s465_s26 }
  0x30   : > { %v485_v0 = vld [vmem:[%s690_s25 + $0xb0] sm:$0x3f]  ;;  %v483_v4 = vld [vmem:[%s690_s25 + $0xa0] sm:$0x3f]  ;;  %v488_v5 = vld [vmem:[%s690_s25 + $0xc8] sm:$0x3f] }
  0x31   : > { %v335_v49 = vmax.f32 %v328_v42, %v478_v39  ;;  %v329_v56 = vmax.f32 %v322_v50, %v476_v47  ;;  %v323_v60 = vmax.f32 %v316_v54, %v474_v51  ;;  %v486_v8 = vld [vmem:[%s690_s25 + $0xb8] sm:$0x3f]  ;;  %v489_v11 = vld [vmem:[%s690_s25 + $0xd0] sm:$0x3f] }
  0x33   : > { %v342_v55 = vmax.f32 %v335_v49, %v481_v46  ;;  %v336_v62 = vmax.f32 %v329_v56, %v479_v53  ;;  %v330_v1 = vmax.f32 %v323_v60, %v477_v57 }
  0x35   : > { %v349_v61 = vmax.f32 %v342_v55, %v484_v52  ;;  %v343_v3 = vmax.f32 %v336_v62, %v482_v59  ;;  %v337_v6 = vmax.f32 %v330_v1, %v480_v63 }
  0x37   : > { %v356_v2 = vmax.f32 %v349_v61, %v487_v58  ;;  %v350_v7 = vmax.f32 %v343_v3, %v485_v0  ;;  %v344_v9 = vmax.f32 %v337_v6, %v483_v4 }
  0x39   : > { %359 = vst [vmem:[%s298_s29] sm:$0x3f] %v356_v2  ;;  %v357_v10 = vmax.f32 %v350_v7, %v488_v5  ;;  %v351_v12 = vmax.f32 %v344_v9, %v486_v8 }
  0x3b   : > { %360 = vst [vmem:[%s298_s29 + $0x8] sm:$0x3f] %v357_v10  ;;  %v358_v13 = vmax.f32 %v351_v12, %v489_v11 }
  0x3d   : > { %361 = vst [vmem:[%s298_s29 + $0x10] sm:$0x3f] %v358_v13 }
  0x3e PF: > { %s11_s10 = sadd.s32 1, %s573_s10   ;;  %s739_s6 = smov %s561_s7 }
  0x3f   : > { %p8_p10 = scmp.ge.s32.totalorder %s11_s10, 4   ;;  %s740_s7 = smov %s620_s14 }
  0x40   : > { %s741_s8 = smov %s569_s9  ;;  %s742_s9 = smov %s744_s11 }
  0x41   :  { %10 = sbr.rel (!%p8_p10) target bundleno = 3 (0x3), region = 105 }

</bundles_post_ra>
